<compile_context>
chip_gen: v7x
topology: tpu7x:2x2x1
jax: 0.10.0
libtpu: 0.0.40
codegen_flags: <defaults>
</compile_context>

<pallas_src>
import jax
import jax.numpy as jnp
from jax import lax
from jax.experimental import pallas as pl
from jax.experimental.pallas import tpu as pltpu


# ---------------------------------------------------------------------------
# generation-aware tiling heuristics
# ---------------------------------------------------------------------------
def _vmem_budget():
    """Return (target_block_bytes, cap_block_bytes, vmem_limit_bytes)."""
    try:
        vmem_cap = pltpu.get_tpu_info().vmem_capacity_bytes
    except Exception:
        vmem_cap = 64 << 20  # be conservative (v7x-class) if the query fails
    if vmem_cap <= (64 << 20):
        # v7x: 64 MiB physical VMEM. 2x input block + scratch must stay well
        # under the scoped limit.
        return 4 << 20, 8 << 20, 48 << 20
    # v5e / v6e: 128 MiB physical VMEM -> bigger blocks amortize the ~0.35 us
    # per-step overhead and lengthen contiguous DMA rows.
    return 8 << 20, 16 << 20, 96 << 20


def _tile_plan(B, C, HW):
    """Pick (tb, hw_tile, vmem_limit_bytes).

    tb is any divisor of B (output block constraint lifted by emitting the
    result as (B, 1, C)).  hw_tile is either the full HW extent (preferred:
    longest contiguous DMA rows) or a multiple of 128 used with a cdiv grid
    and in-kernel tail masking.
    """
    target, cap, vmem_limit = _vmem_budget()
    per_batch = C * HW * 4  # one batch's full-HW f32 slab

    divs = [d for d in range(1, B + 1) if B % d == 0]

    if per_batch <= cap:
        # Keep full HW as the lane dim.
        hw_tile = HW
        fit = [d for d in divs if d * per_batch <= cap]  # d=1 always fits here
        if B >= 2:
            # v7x megacore: keep >= 2 blocks on the parallel (batch) axis.
            two = [d for d in fit if B // d >= 2]
            if two:
                fit = two
        reach = [d for d in fit if d * per_batch >= target]
        tb = min(reach) if reach else max(fit)
    else:
        # Per-batch slab too large: one batch per block, tile HW with a
        # multiple of 128; ragged tail handled in-kernel.
        tb = 1
        lanes = (cap // (C * 4)) // 128 * 128
        lanes = max(lanes, 128)
        hw_tile = min(lanes, pl.cdiv(HW, 128) * 128)

    return tb, hw_tile, vmem_limit


# ---------------------------------------------------------------------------
# fused kernel: streaming global-average-pool + Conv1x1 -> ReLU -> Conv1x1
# ---------------------------------------------------------------------------
def _make_kernel(tb, C, Cr, hw_tile, HW):
    inv_hw = 1.0 / float(HW)
    ragged = (HW % hw_tile) != 0

    def kernel(x_ref, w1_ref, b1_ref, w2_ref, b2_ref, o_ref, acc_ref):
        h = pl.program_id(1)

        @pl.when(h == 0)
        def _init():
            acc_ref[...] = jnp.zeros_like(acc_ref)

        xv = x_ref[...].astype(jnp.float32)               # (tb, C, hw_tile)
        if ragged:
            # Mask the out-of-bounds tail of the last HW tile.
            lane = lax.broadcasted_iota(jnp.int32, (1, 1, hw_tile), 2)
            valid = (h * hw_tile + lane) < HW
            xv = jnp.where(valid, xv, 0.0)

        # Per-step cross-lane reduce (XLU slot is idle in this HBM-bound
        # kernel) into a narrow (tb, C) f32 accumulator.
        acc_ref[...] += jnp.sum(xv, axis=-1)

        @pl.when(h == pl.num_programs(1) - 1)
        def _finalize():
            gap = acc_ref[...] * inv_hw                    # (tb, C)
            hid = jnp.dot(gap, w1_ref[...],
                          preferred_element_type=jnp.float32) + b1_ref[...]
            hid = jnp.maximum(hid, 0.0)                    # (tb, Cr)
            out = jnp.dot(hid, w2_ref[...],
                          preferred_element_type=jnp.float32) + b2_ref[...]
            o_ref[...] = out.reshape(tb, 1, C).astype(o_ref.dtype)

    return kernel


# ---------------------------------------------------------------------------
# wrapper
# ---------------------------------------------------------------------------
def channel_attention(x, w1, b1, w2, b2):
    """x: (B, C, H, W) NCHW float32. Returns (B, C, 1, 1) = ca(gap(x))."""
    B, C, H, W = x.shape
    HW = H * W
    Cr = w1.shape[1]

    x_flat = x.reshape(B, C, HW)          # free reshape (contiguous NCHW)

    tb, hw_tile, vmem_limit = _tile_plan(B, C, HW)
    n_hw = pl.cdiv(HW, hw_tile)
    grid = (B // tb, n_hw)

    kernel = _make_kernel(tb, C, Cr, hw_tile, HW)

    out = pl.pallas_call(
        kernel,
        out_shape=jax.ShapeDtypeStruct((B, 1, C), x.dtype),
        grid_spec=pltpu.PrefetchScalarGridSpec(
            num_scalar_prefetch=0,
            grid=grid,
            in_specs=[
                pl.BlockSpec((tb, C, hw_tile), lambda b, h: (b, 0, h)),
                pl.BlockSpec((C, Cr), lambda b, h: (0, 0)),   # resident weights
                pl.BlockSpec((1, Cr), lambda b, h: (0, 0)),
                pl.BlockSpec((Cr, C), lambda b, h: (0, 0)),
                pl.BlockSpec((1, C), lambda b, h: (0, 0)),
            ],
            out_specs=pl.BlockSpec((tb, 1, C), lambda b, h: (b, 0, 0)),
            scratch_shapes=[pltpu.VMEM((tb, C), jnp.float32)],
        ),
        compiler_params=pltpu.CompilerParams(
            dimension_semantics=("parallel", "arbitrary"),
            vmem_limit_bytes=vmem_limit,
        ),
        cost_estimate=pl.CostEstimate(
            flops=B * C * HW + 4 * B * C * Cr,
            transcendentals=0,
            bytes_accessed=B * C * HW * 4 + B * C * 4
                           + (2 * C * Cr + C + Cr) * 4,
        ),
    )(x_flat, w1, b1.reshape(1, Cr), w2, b2.reshape(1, C))

    return out.reshape(B, C, 1, 1)


def reference(x, w1, b1, w2, b2):
    # Pure-JAX reference of the PyTorch forward.
    gap = jnp.mean(x, axis=(2, 3))                      # (B, C)
    h = jnp.maximum(gap @ w1 + b1, 0.0)                 # (B, Cr)
    out = h @ w2 + b2                                   # (B, C)
    return out[:, :, None, None]


if __name__ == "__main__":
    # dim=32, reduction=8 -> hidden=4 ; NCHW input (B=2, C=32, H=W=16)
    B, C, H, W = 2, 32, 16, 16
    reduction = 8
    Cr = C // reduction

    key = jax.random.PRNGKey(0)
    kx, kw1, kb1, kw2, kb2 = jax.random.split(key, 5)

    x = jax.random.normal(kx, (B, C, H, W), dtype=jnp.float32)

    # Deterministic parameter init (mimics PyTorch Conv2d uniform bounds).
    # Conv1: weight (Cr, C, 1, 1) -> stored transposed as (C, Cr) for row-vector matmul.
    bound1 = 1.0 / (C ** 0.5)
    w1 = jax.random.uniform(kw1, (C, Cr), jnp.float32, -bound1, bound1)
    b1 = jax.random.uniform(kb1, (Cr,), jnp.float32, -bound1, bound1)
    # Conv2: weight (C, Cr, 1, 1) -> stored transposed as (Cr, C).
    bound2 = 1.0 / (Cr ** 0.5)
    w2 = jax.random.uniform(kw2, (Cr, C), jnp.float32, -bound2, bound2)
    b2 = jax.random.uniform(kb2, (C,), jnp.float32, -bound2, bound2)

    out = channel_attention(x, w1, b1, w2, b2)
    out = jax.block_until_ready(out)

    ref = reference(x, w1, b1, w2, b2)
    assert out.shape == (B, C, 1, 1), out.shape
    assert jnp.allclose(out, ref, atol=1e-5, rtol=1e-5), "mismatch vs reference"

    print("KERNEL_OK")
</pallas_src>

<mosaic_0001>
module attributes {stable_mosaic.version = 11 : i64} {
  func.func @kernel(%arg0: i32, %arg1: i32, %arg2: memref<1x32x256xf32, #tpu.memory_space<vmem>>, %arg3: memref<32x4xf32, #tpu.memory_space<vmem>>, %arg4: memref<1x4xf32, #tpu.memory_space<vmem>>, %arg5: memref<4x32xf32, #tpu.memory_space<vmem>>, %arg6: memref<1x32xf32, #tpu.memory_space<vmem>>, %arg7: memref<1x1x32xf32, #tpu.memory_space<vmem>>, %arg8: memref<1x32xf32, #tpu.memory_space<vmem>>) attributes {dimension_semantics = [#tpu.dimension_semantics<parallel>, #tpu.dimension_semantics<arbitrary>], iteration_bounds = array<i64: 2, 1>, scalar_prefetch = 0 : i64, scratch_operands = 1 : i64, tpu.core_type = #tpu.core_type<tc>, window_params = [{transform_indices = @transform_0, window_bounds = array<i64: 1, 32, 256>}, {pipeline_mode = #tpu.pipeline_mode<synchronous>, transform_indices = @transform_1, window_bounds = array<i64: 32, 4>}, {pipeline_mode = #tpu.pipeline_mode<synchronous>, transform_indices = @transform_2, window_bounds = array<i64: 1, 4>}, {pipeline_mode = #tpu.pipeline_mode<synchronous>, transform_indices = @transform_3, window_bounds = array<i64: 4, 32>}, {pipeline_mode = #tpu.pipeline_mode<synchronous>, transform_indices = @transform_4, window_bounds = array<i64: 1, 32>}, {transform_indices = @transform_5, window_bounds = array<i64: 1, 1, 32>}]} {
    %c0_i32 = arith.constant 0 : i32
    %0 = arith.cmpi eq, %arg1, %c0_i32 : i32
    %1 = arith.extui %0 : i1 to i32
    %c0_i32_0 = arith.constant 0 : i32
    %2 = arith.cmpi ne, %1, %c0_i32_0 : i32
    scf.if %2 {
      %cst_9 = arith.constant 0.000000e+00 : f32
      %11 = vector.broadcast %cst_9 : f32 to vector<1x32xf32>
      %c0_10 = arith.constant 0 : index
      %c0_11 = arith.constant 0 : index
      %12 = vector.load %arg8[%c0_10, %c0_11] : memref<1x32xf32, #tpu.memory_space<vmem>>, vector<1x32xf32>
      tpu.vector_store %arg8[%c0_10, %c0_11], %11 {strides = array<i32>} : memref<1x32xf32, #tpu.memory_space<vmem>>, vector<1x32xf32>,
    } else {
    }
    %c0 = arith.constant 0 : index
    %c0_1 = arith.constant 0 : index
    %c0_2 = arith.constant 0 : index
    %3 = vector.load %arg2[%c0, %c0_1, %c0_2] : memref<1x32x256xf32, #tpu.memory_space<vmem>>, vector<1x32x256xf32>
    %c0_3 = arith.constant 0 : index
    %c0_4 = arith.constant 0 : index
    %4 = vector.load %arg8[%c0_3, %c0_4] : memref<1x32xf32, #tpu.memory_space<vmem>>, vector<1x32xf32>
    %cst = arith.constant dense<0.000000e+00> : vector<1x32xf32>
    %5 = vector.multi_reduction <add>, %3, %cst [2] : vector<1x32x256xf32> to vector<1x32xf32>
    %6 = arith.addf %4, %5 : vector<1x32xf32>
    %c0_5 = arith.constant 0 : index
    %c0_6 = arith.constant 0 : index
    %7 = vector.load %arg8[%c0_5, %c0_6] : memref<1x32xf32, #tpu.memory_space<vmem>>, vector<1x32xf32>
    tpu.vector_store %arg8[%c0_5, %c0_6], %6 {strides = array<i32>} : memref<1x32xf32, #tpu.memory_space<vmem>>, vector<1x32xf32>,
    %c0_i32_7 = arith.constant 0 : i32
    %8 = arith.cmpi eq, %arg1, %c0_i32_7 : i32
    %9 = arith.extui %8 : i1 to i32
    %c0_i32_8 = arith.constant 0 : i32
    %10 = arith.cmpi ne, %9, %c0_i32_8 : i32
    scf.if %10 {
      %c0_9 = arith.constant 0 : index
      %c0_10 = arith.constant 0 : index
      %11 = vector.load %arg8[%c0_9, %c0_10] : memref<1x32xf32, #tpu.memory_space<vmem>>, vector<1x32xf32>
      %cst_11 = arith.constant 3.906250e-03 : f32
      %12 = vector.broadcast %cst_11 : f32 to vector<1x32xf32>
      %13 = arith.mulf %11, %12 : vector<1x32xf32>
      %c0_12 = arith.constant 0 : index
      %c0_13 = arith.constant 0 : index
      %14 = vector.load %arg3[%c0_12, %c0_13] : memref<32x4xf32, #tpu.memory_space<vmem>>, vector<32x4xf32>
      %cst_14 = arith.constant dense<0.000000e+00> : vector<1x4xf32>
      %15 = tpu.matmul %13, %14, %cst_14 {dimension_numbers = #tpu.dot_dimension_numbers<[1], [0], [0], [1], [0, 0, 1, 1], [], []>} : vector<1x32xf32>, vector<32x4xf32>, vector<1x4xf32> -> vector<1x4xf32>
      %c0_15 = arith.constant 0 : index
      %c0_16 = arith.constant 0 : index
      %16 = vector.load %arg4[%c0_15, %c0_16] : memref<1x4xf32, #tpu.memory_space<vmem>>, vector<1x4xf32>
      %17 = arith.addf %15, %16 : vector<1x4xf32>
      %cst_17 = arith.constant 0.000000e+00 : f32
      %18 = vector.broadcast %cst_17 : f32 to vector<1x4xf32>
      %19 = arith.maximumf %17, %18 : vector<1x4xf32>
      %c0_18 = arith.constant 0 : index
      %c0_19 = arith.constant 0 : index
      %20 = vector.load %arg5[%c0_18, %c0_19] : memref<4x32xf32, #tpu.memory_space<vmem>>, vector<4x32xf32>
      %cst_20 = arith.constant dense<0.000000e+00> : vector<1x32xf32>
      %21 = tpu.matmul %19, %20, %cst_20 {dimension_numbers = #tpu.dot_dimension_numbers<[1], [0], [0], [1], [0, 0, 1, 1], [], []>} : vector<1x4xf32>, vector<4x32xf32>, vector<1x32xf32> -> vector<1x32xf32>
      %c0_21 = arith.constant 0 : index
      %c0_22 = arith.constant 0 : index
      %22 = vector.load %arg6[%c0_21, %c0_22] : memref<1x32xf32, #tpu.memory_space<vmem>>, vector<1x32xf32>
      %23 = arith.addf %21, %22 : vector<1x32xf32>
      %24 = vector.shape_cast %23 : vector<1x32xf32> to vector<1x1x32xf32>
      %c0_23 = arith.constant 0 : index
      %c0_24 = arith.constant 0 : index
      %c0_25 = arith.constant 0 : index
      %25 = vector.load %arg7[%c0_23, %c0_24, %c0_25] : memref<1x1x32xf32, #tpu.memory_space<vmem>>, vector<1x1x32xf32>
      tpu.vector_store %arg7[%c0_23, %c0_24, %c0_25], %24 {strides = array<i32>} : memref<1x1x32xf32, #tpu.memory_space<vmem>>, vector<1x1x32xf32>,
    } else {
    }
    return
  }
  func.func @transform_0(%arg0: i32, %arg1: i32) -> (i32, i32, i32) {
    %c0_i32 = arith.constant 0 : i32
    %c0_i32_0 = arith.constant 0 : i32
    return %arg0, %c0_i32, %arg1 : i32, i32, i32
  }
  func.func @transform_1(%arg0: i32, %arg1: i32) -> (i32, i32) {
    %c0_i32 = arith.constant 0 : i32
    %c0_i32_0 = arith.constant 0 : i32
    %c0_i32_1 = arith.constant 0 : i32
    return %c0_i32, %c0_i32_0 : i32, i32
  }
  func.func @transform_2(%arg0: i32, %arg1: i32) -> (i32, i32) {
    %c0_i32 = arith.constant 0 : i32
    %c0_i32_0 = arith.constant 0 : i32
    %c0_i32_1 = arith.constant 0 : i32
    return %c0_i32, %c0_i32_0 : i32, i32
  }
  func.func @transform_3(%arg0: i32, %arg1: i32) -> (i32, i32) {
    %c0_i32 = arith.constant 0 : i32
    %c0_i32_0 = arith.constant 0 : i32
    %c0_i32_1 = arith.constant 0 : i32
    return %c0_i32, %c0_i32_0 : i32, i32
  }
  func.func @transform_4(%arg0: i32, %arg1: i32) -> (i32, i32) {
    %c0_i32 = arith.constant 0 : i32
    %c0_i32_0 = arith.constant 0 : i32
    %c0_i32_1 = arith.constant 0 : i32
    return %c0_i32, %c0_i32_0 : i32, i32
  }
  func.func @transform_5(%arg0: i32, %arg1: i32) -> (i32, i32, i32) {
    %c0_i32 = arith.constant 0 : i32
    %c0_i32_0 = arith.constant 0 : i32
    %c0_i32_1 = arith.constant 0 : i32
    return %arg0, %c0_i32, %c0_i32_0 : i32, i32, i32
  }
}

</mosaic_0001>

<bundles_post_ra>
// kernel: tpu_custom_call.1
= control target key start
LH: loop header
LB: loop body
LE: loop exit
PB: predicated region body
PF: predicated region fallthrough
CT: control target
= control target key end

     0   :  { %10 = vsyncpa [#allocation4], 0  ;;  %s1487_s0 = inlined_call_operand.hbm [shape: f32[2,32,256], index: 0, kind: input, shape index: {}]   ;;  %s1488_s1 = inlined_call_operand.vmem [shape: f32[32,4], index: 1, kind: input, shape index: {}]   ;;  %s1489_s2 = inlined_call_operand.vmem [shape: f32[1,4], index: 2, kind: input, shape index: {}]   ;;  %s1490_s3 = inlined_call_operand.vmem [shape: f32[4,32], index: 3, kind: input, shape index: {}]   ;;  %s1491_s4 = inlined_call_operand.vmem [shape: f32[1,32], index: 4, kind: input, shape index: {}]   ;;  %s1492_s5 = inlined_call_operand.hbm [shape: f32[2,1,32], index: 5, kind: output, shape index: {}]  }
   0x1   :  { %12 = vsyncpa [#allocation4 + $0x1], 0 }
   0x2   :  { %13 = vsyncpa [#allocation5], 0 }
   0x3   :  { %15 = vsyncpa [#allocation5 + $0x1], 0  ;;  %s1196_s18 = smov 0   ;;  %s1198_s19 = smov 0  }
   0x4   :  { %s1200_s20 = smov 0   ;;  %s1202_s21 = smov 0  }
   0x5   :  { %s1204_s22 = smov 0   ;;  %s1206_s23 = smov 0  }
   0x6 LB: > { %s927_s24 = sadd.s32 4294967295, %s1155_s23   ;;  %s928_s25 = sadd.s32 4294967294, %s1155_s23   ;;  %s1155_s23 = sphi %s1206_s23, %s21_s23   ;;  %s1151_s22 = sphi %s1204_s22, %s1507_s22   ;;  %s1147_s21 = sphi %s1202_s21, %s1506_s21   ;;  %s1143_s20 = sphi %s1200_s20, %s1505_s20   ;;  %s1139_s19 = sphi %s1198_s19, %s1504_s19   ;;  %s1135_s18 = sphi %s1196_s18, %s1503_s18  }
   0x7   : > { %s33_s26 = sadd.s32 1, %s1151_s22  ;;  %s42_s27 = sadd.s32 1, %s1143_s20 }
   0x8   : > { %p35_p0 = scmp.ge.s32.totalorder %s33_s26, 2  ;;  %p49_p1 = scmp.ne.s32.totalorder %s1143_s20, %s1139_s19 }
   0x9   : > { %p50_p2 = scmp.eq.s32.totalorder %s1155_s23, 0  ;;  %p55_p3 = scmp.ne.s32.totalorder %s1139_s19, %s1135_s18 }
   0xa   : > { %s1509_s26 = smov (%p35_p0, %s33_s26), 0  ;;  %p56_p5 = scmp.eq.s32.totalorder %s927_s24, 0 }
   0xb   : > { %p1237_p4 = por %p50_p2, %p49_p1  ;;  %s37_s29 = ssub.s32 %s1151_s22, %s1509_s26 }
   0xc   : > { %p163_p6 = scmp.eq.s32.totalorder %s927_s24, 1  ;;  %p40_p7 = scmp.eq.s32.totalorder %s37_s29, 0 }
   0xd   : > { %p1243_p8 = por %p56_p5, %p55_p3  ;;  %p169_p10 = scmp.eq.s32.totalorder %s928_s25, 1 }
   0xe   : > { %p1247_p9 = por %p163_p6, %p49_p1  ;;  %p984_p13 = scmp.lt.s32.totalorder %s1155_s23, 2 }
   0xf   : > { %s1252_s7 = scalar_select %p40_p7, %s1143_s20, %s42_s27  }
  0x10   : > { %s1496_s6 = scalar_select %p1247_p9, 1, 0 }
  0x11   : > { %p1254_p11 = por %p169_p10, %p55_p3  ;;  %s201_s9 = sand.u32 1, %s1143_s20  }
  0x12   : > { %s931_s10 = sshll.u32 %s201_s9, 6  ;;  %s942_s11 = sshll.u32 %s1151_s22, 10 }
  0x13   : > { %s1497_s8 = scalar_select %p1254_p11, 1, 0 }
  0x14   : > { %s1265_s14 = scalar_lea.hbm %s1487_s0, %s942_s11  ;;  %s205_s15 = scalar_lea.vmem [#allocation3], %s931_s10 }
  0x15   : > { %s214_s16 = sshll.u32 %s205_s15, 4  ;;  %p1271_p0 = pnand %p984_p13, %p1237_p4  ;;  %s1267_s16 = int_to_ptr.vmem [resolvable:$true] %s214_s16 }
  0x16   : > { %s1276_s24 = scalar_lea.sflag [#allocation4], %s201_s9  ;;  %s1043_s25 = scalar_lea.hbm %s1265_s14, 1024 }
  0x17   : > { %p1044_p2 = scmp.ne.s32.totalorder %s1265_s14, %s1043_s25  ;;  %p1045_p3 = pneg %p1271_p0 }
  0x18   : > { %s1048_s28 = scalar_lea.hbm %s1487_s0, 2048  ;;  %p1049_p4 = scmp.lt.u32.totalorder %s1265_s14, %s1487_s0 }
  0x19   : > { %p1046_p5 = pnand %p1045_p3, %p1044_p2  ;;  %p1050_p7 = scmp.lt.u32.totalorder %s1048_s28, %s1043_s25 }
  0x1a   : > { %p1052_p13 = scmp.lt.u32.totalorder %s1043_s25, %s1265_s14 }
  0x1b   : > { %p1047_p6 = pneg %p1046_p5  ;;  %p1051_p10 = por %p1050_p7, %p1049_p4 }
  0x1d   : > { %p1053_p12 = por %p1052_p13, %p1051_p10 }
  0x1f   : > { %p1054_p1 = pnand %p1053_p12, %p1047_p6 }
  0x21   : > { %1057 = shalt.err (!%p1054_p1)
}
  0x22   : > { %s1058_s9 = scalar_lea.vmem %s1267_s16, 1024  ;;  %s1157_s12 = smov [#allocation3]  }
  0x23   : > { %p1059_p2 = scmp.ne.s32.totalorder %s1267_s16, %s1058_s9  ;;  %s1063_s13 = sshll.u32 %s1157_s12, 4  ;;  %s1064_s13 = int_to_ptr.vmem [resolvable:$false] %s1063_s13 }
  0x24   : > { %s1065_s15 = scalar_lea.vmem %s1064_s13, 2048  ;;  %p1066_p9 = scmp.lt.s32.totalorder %s1267_s16, %s1064_s13 }
  0x25   : > { %p1061_p5 = pnand %p1059_p2, %p1045_p3  ;;  %p1067_p4 = scmp.lt.s32.totalorder %s1065_s15, %s1058_s9 }
  0x27   : > { %p1062_p11 = pneg %p1061_p5  ;;  %p1068_p7 = por %p1067_p4, %p1066_p9 }
  0x29   : > { %p1069_p10 = pnand %p1068_p7, %p1062_p11 }
  0x2b   : > { %1072 = shalt.err (!%p1069_p10)
}
  0x2c   : > { %s1158_s25 = smov 256   ;;  %s1159_s27 = smov 16  }
  0x2d   : > { %979 = dma.hbm_to_vmem [thread:$0]  (!%p1271_p0), %s1265_s14, 1024, %s1267_s16, %s1276_s24, %s1158_s25, %s1158_s25, %s1159_s27  }
  0x2e   : > { %p222_p12 = scmp.lt.s32.totalorder %s1155_s23, 3  ;;  %p1499_p1 = scmp.ge.s32.totalorder %s1155_s23, 1 }
  0x30   : > { %p223_p3 = pnand %p1499_p1, %p222_p12 }
  0x31   : > { %s1308_s29 = sand.u32 (!%p223_p3), 1, %s1139_s19  }
  0x32   : > { %226 = sbr.rel (%p223_p3) target bundleno = 822 (0x336), region = 40  ;;  %s935_s28 = sshll.u32 (!%p223_p3), %s1308_s29, 6 }
  0x33   : > { %s229_s10 = scalar_lea.sflag (!%p223_p3), [#allocation4], %s1308_s29  ;;  %s232_s11 = scalar_lea.vmem (!%p223_p3), [#allocation3], %s935_s28 }
  0x39   : > { %1126 = dma.done.wait (%p1243_p8), %s229_s10, 1024  }
  0x3a   : > { %1128 = vsyncadd (%p1243_p8), %s229_s10, 4294966272  ;;  %v265_v0 = vld [vmem:[%s232_s11] sm:$0xff]  ;;  %v266_v1 = vld [vmem:[%s232_s11 + $0x8] sm:$0xff]  ;;  %v1160_v12 = vmov 0   ;;  %v290_v13 = vlaneseq  ;;  %v1161_v14 = vmov 1966171168  }
  0x3b   : > { %v267_v2 = vld [vmem:[%s232_s11 + $0x10] sm:$0xff]  ;;  %v274_v3 = vadd.f32 %v266_v1, %v265_v0  ;;  %v268_v4 = vld [vmem:[%s232_s11 + $0x18] sm:$0xff]  ;;  %v269_v5 = vld [vmem:[%s232_s11 + $0x20] sm:$0xff]  ;;  %1041 = vset.pattern.permute.xlu0 %v1160_v12  ;;  %1042 = vset.pattern.permute.xlu1 %v1160_v12  ;;  %v423_v15 = vunpack.c.l.s4 %v1161_v14  ;;  %vm263_vm0 = vcmask 253952   ;;  %vm1164_vm1 = vmmov 0   ;;  %s939_s30 = sshll.u32 %s1147_s21, 4 }
  0x3c   : > { %v270_v6 = vld [vmem:[%s232_s11 + $0x28] sm:$0xff]  ;;  %v271_v8 = vld [vmem:[%s232_s11 + $0x30] sm:$0xff]  ;;  %v272_v9 = vld [vmem:[%s232_s11 + $0x38] sm:$0xff]  ;;  %v277_v10 = vadd.f32 %v268_v4, %v267_v2  ;;  %v1317_v16 = vshrl.u32 %v290_v13, 7  ;;  %vm637_vm2 = vcmask 130112   ;;  %vm644_vm3 = vcmask 195712   ;;  %s1437_s9 = scalar_lea.hbm %s1492_s5, %s939_s30 }
  0x3d   : > { %v280_v7 = vadd.f32 %v270_v6, %v269_v5  ;;  %275 = vadd.xlane.f32.xlu0 %v274_v3  ;;  %v283_v11 = vadd.f32 %v272_v9, %v271_v8  ;;  %v424_v17 = vunpack.c.0.s8 %v423_v15  ;;  %vm651_vm4 = vcmask 261312   ;;  %s257_s14 = scalar_lea.vmem [#allocation6], %s1308_s29  ;;  %s838_s12 = scalar_lea.sflag [#allocation5], %s1308_s29 }
  0x3e   : > { %v1320_v18 = vsub.s32 0, %v1317_v16  ;;  %v1323_v19 = vsub.s32 1, %v1317_v16  ;;  %v1326_v20 = vsub.s32 2, %v1317_v16  ;;  %v1329_v21 = vsub.s32 3, %v1317_v16  ;;  %s850_s16 = sshll.u32 %s257_s14, 4  ;;  %p1500_p9 = scmp.ne.s32.totalorder %s1496_s6, 0  ;;  %s1439_s16 = int_to_ptr.vmem [resolvable:$true] %s850_s16 }
  0x3f   : > { %281 = vadd.xlane.f32.xlu1 %v280_v7  ;;  %v1332_v22 = vsub.s32 4, %v1317_v16  ;;  %v1335_v23 = vsub.s32 5, %v1317_v16  ;;  %v1338_v24 = vsub.s32 6, %v1317_v16  ;;  %v1341_v25 = vsub.s32 7, %v1317_v16  ;;  %s1073_s13 = scalar_lea.vmem %s1439_s16, 16  ;;  %s1165_s21 = smov [#allocation6]  }
  0x40   : > { %v1344_v27 = vsub.s32 %v424_v17, %v1317_v16  ;;  %vm681_vm5 = vcmask 261120   ;;  %vm762_vm6 = vcmask 1043456   ;;  %vm758_vm7 = vcmask 31744   ;;  %p1074_p8 = scmp.ne.s32.totalorder %s1439_s16, %s1073_s13  ;;  %s1077_s15 = sshll.u32 %s1165_s21, 4  ;;  %s1078_s15 = int_to_ptr.vmem [resolvable:$false] %s1077_s15 }
  0x41   : > { %278 = vadd.xlane.f32.xlu0 %v277_v10  ;;  %s1079_s25 = scalar_lea.vmem %s1078_s15, 32  ;;  %p1080_p6 = scmp.lt.s32.totalorder %s1439_s16, %s1078_s15 }
  0x42   : > { %p1075_p11 = pnand %p1074_p8, %p1500_p9  ;;  %p1081_p13 = scmp.lt.s32.totalorder %s1079_s25, %s1073_s13 }
  0x43   : > { %284 = vadd.xlane.f32.xlu1 %v283_v11 }
  0x44   : > { %p1076_p0 = pneg %p1075_p11  ;;  %p1082_p2 = por %p1081_p13, %p1080_p6 }
  0x46   : > { %p1083_p5 = pnand %p1082_p2, %p1076_p0 }
  0xca   : > { %v276_v26 = vpop.xlane.xlu0 %275 }
  0xcb   : > { %v293_v29 = vrot.slane %v276_v26, %v1320_v18  ;;  %v297_v30 = vrot.slane %v276_v26, %v1323_v19  ;;  %v301_v31 = vrot.slane %v276_v26, %v1326_v20  ;;  %v305_v32 = vrot.slane %v276_v26, %v1329_v21 }
  0xcc   : > { %v282_v28 = vpop.xlane.xlu1 %281  ;;  %v309_v33 = vrot.slane %v276_v26, %v1332_v22  ;;  %v313_v34 = vrot.slane %v276_v26, %v1335_v23  ;;  %v317_v35 = vrot.slane %v276_v26, %v1338_v24  ;;  %v321_v36 = vrot.slane %v276_v26, %v1341_v25 }
  0xcd   : > { %v418_v37 = vcombine.low %v293_v29, %v297_v30  ;;  %v419_v38 = vcombine.low %v301_v31, %v305_v32  ;;  %v357_v39 = vrot.slane %v282_v28, %v1320_v18  ;;  %v361_v40 = vrot.slane %v282_v28, %v1323_v19 }
  0xce   : > { %v279_v41 = vpop.xlane.xlu0 %278  ;;  %v420_v42 = vcombine.low %v309_v33, %v313_v34  ;;  %v421_v43 = vcombine.low %v317_v35, %v321_v36  ;;  %v365_v44 = vrot.slane %v282_v28, %v1326_v20  ;;  %v369_v45 = vrot.slane %v282_v28, %v1329_v21 }
  0xcf   : > { %v428_v46 = vrot.slane %v418_v37, %v1344_v27  ;;  %v435_v47 = vrot.slane %v419_v38, %v1344_v27  ;;  %v325_v48 = vrot.slane %v279_v41, %v1320_v18  ;;  %v329_v49 = vrot.slane %v279_v41, %v1323_v19 }
  0xd0   : > { %v442_v50 = vrot.slane %v420_v42, %v1344_v27  ;;  %v449_v51 = vrot.slane %v421_v43, %v1344_v27  ;;  %v333_v52 = vrot.slane %v279_v41, %v1326_v20  ;;  %v337_v53 = vrot.slane %v279_v41, %v1329_v21  ;;  %v285_v2 = vpop.xlane.xlu1 %284 }
  0xd1   : > { %v450_v54 = vcombine.low %v428_v46, %v435_v47  ;;  %v341_v55 = vrot.slane %v279_v41, %v1332_v22  ;;  %v345_v56 = vrot.slane %v279_v41, %v1335_v23  ;;  %v349_v57 = vrot.slane %v279_v41, %v1338_v24 }
  0xd2   : > { %v451_v58 = vcombine.low %v442_v50, %v449_v51  ;;  %v353_v59 = vrot.slane %v279_v41, %v1341_v25  ;;  %v467_v60 = vcombine.low %v325_v48, %v329_v49  ;;  %v468_v61 = vcombine.low %v333_v52, %v337_v53 }
  0xd3   : > { %v458_v62 = vrot.slane %v450_v54, %v1344_v27  ;;  %v469_v63 = vcombine.low %v341_v55, %v345_v56  ;;  %v373_v0 = vrot.slane %v282_v28, %v1332_v22  ;;  %v377_v1 = vrot.slane %v282_v28, %v1335_v23  ;;  %v676_v55 = vld [vmem:[%s1488_s1] sm:$0xff]  ;;  %v677_v56 = vld [vmem:[%s1488_s1 + $0x8] sm:$0xff] }
  0xd4   : > { %v465_v3 = vrot.slane %v451_v58, %v1344_v27  ;;  %v470_v4 = vcombine.low %v349_v57, %v353_v59  ;;  %v477_v5 = vrot.slane %v467_v60, %v1344_v27  ;;  %v484_v6 = vrot.slane %v468_v61, %v1344_v27  ;;  %v678_v57 = vld [vmem:[%s1488_s1 + $0x10] sm:$0xff]  ;;  %v679_v60 = vld [vmem:[%s1488_s1 + $0x18] sm:$0xff] }
  0xd5   : > { %v491_v7 = vrot.slane %v469_v63, %v1344_v27  ;;  %v381_v8 = vrot.slane %v282_v28, %v1338_v24  ;;  %v385_v9 = vrot.slane %v282_v28, %v1341_v25  ;;  %v516_v10 = vcombine.low %v357_v39, %v361_v40 }
  0xd6   : > { %v466_v11 = vcombine.low %v458_v62, %v465_v3  ;;  %v498_v12 = vrot.slane %v470_v4, %v1344_v27  ;;  %v499_v14 = vcombine.low %v477_v5, %v484_v6  ;;  %v517_v15 = vcombine.low %v365_v44, %v369_v45 }
  0xd7   : > { %v518_v17 = vcombine.low %v373_v0, %v377_v1  ;;  %v519_v26 = vcombine.low %v381_v8, %v385_v9  ;;  %v526_v29 = vrot.slane %v516_v10, %v1344_v27  ;;  %v389_v30 = vrot.slane %v285_v2, %v1320_v18 }
  0xd8   : > { %615 = vperm.xlu0 %1041, %v466_v11   ;;  %v500_v31 = vcombine.low %v491_v7, %v498_v12  ;;  %v507_v32 = vrot.slane %v499_v14, %v1344_v27  ;;  %v533_v33 = vrot.slane %v517_v15, %v1344_v27  ;;  %v393_v28 = vrot.slane %v285_v2, %v1323_v19 }
  0xd9   : > { %v540_v34 = vrot.slane %v518_v17, %v1344_v27  ;;  %v547_v35 = vrot.slane %v519_v26, %v1344_v27  ;;  %v397_v36 = vrot.slane %v285_v2, %v1326_v20  ;;  %v401_v37 = vrot.slane %v285_v2, %v1329_v21 }
  0xda   : > { %v514_v38 = vrot.slane %v500_v31, %v1344_v27  ;;  %v548_v39 = vcombine.low %v526_v29, %v533_v33  ;;  %v405_v18 = vrot.slane %v285_v2, %v1332_v22  ;;  %v409_v40 = vrot.slane %v285_v2, %v1335_v23  ;;  %v756_v33 = vld [vmem:[%s1490_s3] sm:$0xf] }
  0xdb   : > { %v549_v41 = vcombine.low %v540_v34, %v547_v35  ;;  %v413_v42 = vrot.slane %v285_v2, %v1338_v24  ;;  %v417_v19 = vrot.slane %v285_v2, %v1341_v25  ;;  %v565_v43 = vcombine.low %v389_v30, %v393_v28  ;;  %v680_v28 = vld [vmem:[%s1489_s2] sm:$0x1] }
  0xdc   : > { %v515_v44 = vcombine.low %v507_v32, %v514_v38  ;;  %v556_v45 = vrot.slane %v548_v39, %v1344_v27  ;;  %v566_v46 = vcombine.low %v397_v36, %v401_v37  ;;  %v567_v20 = vcombine.low %v405_v18, %v409_v40  ;;  %v757_v37 = vld [vmem:[%s1491_s4] sm:$0x1] }
  0xdd   : > { %v563_v21 = vrot.slane %v549_v41, %v1344_v27  ;;  %v568_v47 = vcombine.low %v413_v42, %v417_v19  ;;  %v575_v48 = vrot.slane %v565_v43, %v1344_v27  ;;  %v1162_v54 = vmov 0.0  }
  0xde   : > { %618 = vperm.xlu1 %1042, %v515_v44   ;;  %v582_v22 = vrot.slane %v566_v46, %v1344_v27  ;;  %v589_v23 = vrot.slane %v567_v20, %v1344_v27  ;;  %264 = vst.msk [vmem:[#allocation2] sm:$0x1] %vm263_vm0, %v1162_v54  ;;  %961 = vmatprep.subr.mxu1 %v1162_v54  ;;  %v1163_v58 = vmov 0.0|0.0   ;;  %v627_v62 = vand.u32 127, %v290_v13 }
  0xdf   : > { %v564_v49 = vcombine.low %v556_v45, %v563_v21  ;;  %v596_v24 = vrot.slane %v568_v47, %v1344_v27  ;;  %966 = vmatprep.subr.bf16.mxu0 %v1163_v58  ;;  %v967_v59 = vpack.c.bf16 %v677_v56, %v676_v55  ;;  %v970_v61 = vpack.c.bf16 %v679_v60, %v678_v57 }
  0xe0   : > { %v597_v25 = vcombine.low %v575_v48, %v582_v22  ;;  %958 = vmatprep.mubr.msk.f32.mxu0 %vm1164_vm1, %v1162_v54  ;;  %963 = vmatprep.mubr.msk.f32.mxu1 %vm1164_vm1, %v1162_v54  ;;  %v632_v63 = vadd.s32 4294967288, %v627_v62  ;;  %v639_v0 = vadd.s32 4294967280, %v627_v62  ;;  %v646_v3 = vadd.s32 4294967272, %v627_v62 }
  0xe1   : > { %v598_v50 = vcombine.low %v589_v23, %v596_v24  ;;  %968 = vmatpush3.bf16.msra.mxu0 %v967_v59  ;;  %v630_v5 = vsub.s32 %v627_v62, %v1317_v16  ;;  %962 = vmatpush3.msk.msra.mxu1 %vm762_vm6, %v756_v33 }
  0xe2   : > { %621 = vperm.xlu1 %1042, %v564_v49   ;;  %v605_v51 = vrot.slane %v597_v25, %v1344_v27  ;;  %969 = vmatprep.subr.bf16.mxu0 %v1163_v58  ;;  %v635_v2 = vsub.s32 %v632_v63, %v1317_v16  ;;  %v642_v4 = vsub.s32 %v639_v0, %v1317_v16 }
  0xe3   : > { %v612_v52 = vrot.slane %v598_v50, %v1344_v27  ;;  %v649_v9 = vsub.s32 %v646_v3, %v1317_v16 }
  0xe5   : > { %v613_v53 = vcombine.low %v605_v51, %v612_v52  ;;  %971 = vmatpush3.bf16.msra.mxu0 %v970_v61  ;;  %v273_v29 = vld [vmem:[#allocation2] sm:$0x1] }
  0xe7   : > { %624 = vperm.xlu1 %1042, %v613_v53  }
 0x157   : > { %v616_v7 = vpop.permute.xlu0 %615 }
 0x158   : > { %v631_v11 = vrot.slane %v616_v7, %v630_v5 }
 0x15d   : > { %v619_v1 = vpop.permute.xlu1 %618 }
 0x15e   : > { %v636_v8 = vrot.slane %v619_v1, %v635_v2 }
 0x160   : > { %v638_v12 = vsel %vm637_vm2, %v636_v8, %v631_v11 }
 0x161   : > { %v622_v6 = vpop.permute.xlu1 %621 }
 0x162   : > { %v643_v10 = vrot.slane %v622_v6, %v642_v4 }
 0x164   : > { %v645_v15 = vsel %vm644_vm3, %v643_v10, %v638_v12 }
 0x166   : > { %v625_v13 = vpop.permute.xlu1 %624 }
 0x167   : > { %v650_v14 = vrot.slane %v625_v13, %v649_v9 }
 0x169   : > { %v652_v17 = vsel %vm651_vm4, %v650_v14, %v645_v15 }
 0x16a   : > { %v659_v26 = vrot.slane %v652_v17, %v1344_v27 }
 0x16c   : > { %v666_v30 = vrot.slane %v659_v26, %v1344_v27 }
 0x16e   : > { %v668_v31 = vadd.f32 %v666_v30, %v273_v29 }
 0x170   : > { %670 = vst.msk [vmem:[#allocation2] sm:$0x1] %vm263_vm0, %v668_v31 }
 0x177   : > { %v674_v16 = vld [vmem:[#allocation2] sm:$0x1] }
 0x178   : > { %v675_v32 = vmul.f32 0.00390625, %v674_v16 }
 0x17a   : > { %959 = vmatmul.mubr.msk.f32.vlgmr.msra.gmra.mrb[0].mxu0 %vm681_vm5, %v675_v32 }
 0x24d   : > { %v751_v27 = vpop.f32.mrb[0].mxu0 }
 0x24e   : > { %v752_v34 = vadd.f32 %v751_v27, %v680_v28  ;;  %v960_v35 = vpop.f32.mrb[1].mxu0 }
 0x250   : > { %v755_v36 = vmax.f32 %v752_v34, 0.0 }
 0x252   : > { %964 = vmatmul.mubr.msk.f32.vlgmr.msra.gmra.mrb[0].mxu1 %vm758_vm7, %v755_v36 }
 0x325   : > { %v832_v38 = vpop.f32.mrb[0].mxu1 }
 0x326   : > { %v833_v39 = vadd.f32 %v832_v38, %v757_v37  ;;  %v965_v18 = vpop.f32.mrb[1].mxu1 }
 0x328   : > { %836 = vst.msk [vmem:[%s257_s14] sm:$0x1] %vm263_vm0, %v833_v39 }
 0x329   : > { %1086 = shalt.err (!%p1083_p5)
}
 0x32a   : > { %s1087_s29 = scalar_lea.hbm %s1437_s9, 16  ;;  %s1091_s10 = scalar_lea.hbm %s1492_s5, 32 }
 0x32b   : > { %p1088_p4 = scmp.ne.s32.totalorder %s1437_s9, %s1087_s29  ;;  %p1092_p12 = scmp.lt.u32.totalorder %s1437_s9, %s1492_s5 }
 0x32c   : > { %p1093_p1 = scmp.lt.u32.totalorder %s1091_s10, %s1087_s29  ;;  %p1095_p8 = scmp.lt.u32.totalorder %s1087_s29, %s1437_s9 }
 0x32d   : > { %p1089_p7 = pnand %p1088_p4, %p1500_p9 }
 0x32e   : > { %p1094_p3 = por %p1093_p1, %p1092_p12 }
 0x32f   : > { %p1090_p10 = pneg %p1089_p7 }
 0x330   : > { %p1096_p11 = por %p1095_p8, %p1094_p3 }
 0x332   : > { %p1097_p0 = pnand %p1096_p11, %p1090_p10 }
 0x334   : > { %1100 = shalt.err (!%p1097_p0)
}
 0x335   : > { %974 = dma.vmem_to_hbm [thread:$0]  (%p1500_p9), %s1439_s16, 16, %s1437_s9, %s838_s12  }
 0x336 PF: > { %s862_s14 = sand.u32 1, %s1135_s18   ;;  %p1501_p6 = scmp.ne.s32.totalorder %s1497_s8, 0 }
 0x337   : > { %p1502_p13 = scmp.ge.s32.totalorder %s1155_s23, 2  ;;  %s863_s17 = scalar_lea.sflag [#allocation5], %s862_s14 }
 0x339   : > { %p981_p2 = pnand %p1502_p13, %p1501_p6 }
 0x33b   : > { %1130 = dma.done.wait (!%p981_p2), %s863_s17, 16  }
 0x33c   : > { %1132 = vsyncadd (!%p981_p2), %s863_s17, 4294967280  ;;  %s21_s23 = sadd.s32 1, %s1155_s23   ;;  %s1503_s18 = smov %s1139_s19 }
 0x33d   : > { %p18_p5 = scmp.ge.s32.totalorder %s21_s23, 4   ;;  %s1504_s19 = smov %s1143_s20 }
 0x33e   : > { %s1505_s20 = smov %s1252_s7  ;;  %s1506_s21 = smov %s1151_s22 }
 0x33f   : > { %s1507_s22 = smov %s1509_s26  ;;  %20 = sbr.rel (!%p18_p5) target bundleno = 6 (0x6), region = 93 }
 0x346   :  { %867 = vsyncpa [#allocation4], 1 }
 0x347   :  { %869 = vsyncpa [#allocation4 + $0x1], 1 }
 0x348   :  { %870 = vsyncpa [#allocation5], 1 }
 0x349   :  { %872 = vsyncpa [#allocation5 + $0x1], 1 }

</bundles_post_ra>
